<compile_context>
chip_gen: v7x
topology: tpu7x:2x2x1
jax: 0.10.0
libtpu: 0.0.40
codegen_flags: <defaults>
</compile_context>

<pallas_src>
from functools import partial

import jax
import jax.numpy as jnp
from jax.experimental import pallas as pl
from jax.experimental.pallas import tpu as pltpu


_COLS = 52                       # feature width of the module's weight
_LANE_PACK = 32                  # 32 * 52 = 1664 = 13 * 128  -> lane-dense
_PACKED_COLS = _LANE_PACK * _COLS


# ----------------------------------------------------------------------------
# Kernel bodies
# ----------------------------------------------------------------------------
def _generator_kernel(delta):
    """Single-instance fused kernel: (1,52) weight, (2,52) x."""
    def kernel(w_ref, x_ref, out_ref, wm_ref):
        # weight_mapped = tanh(w) * delta + 1   (EUP tanh + VPU mul/add, f32)
        wm = jnp.tanh(w_ref[...]) * delta + 1.0          # (1, 52)
        wm_ref[...] = wm
        # kron(ones(2,1), wm) * x  ==  row-broadcast multiply (implicit bcast).
        out_ref[...] = x_ref[...] * wm
    return kernel


def _scale_kernel(wm_ref, x_ref, out_ref):
    """Batched body: weight_mapped is precomputed and lane-packed; the per-step
    work is a single full-lane VPU multiply (no per-step tanh, no wm output)."""
    out_ref[...] = x_ref[...] * wm_ref[...]              # (tile, 1664) * (1, 1664)


# ----------------------------------------------------------------------------
# Tiling helper
# ----------------------------------------------------------------------------
def _pick_packed_tile(n_packed_rows):
    """Pick the packed-row tile size.

    Targets ~1.7 MiB blocks (256 x 1664 f32): big enough to amortize the
    ~0.35 us per-step overhead and sit near the HBM roofline, small enough
    that double-buffered in+out streams stay well under v5e's 16 MiB scoped
    VMEM default (and v7x's 64 MiB physical VMEM). Keeps grid >= 2 when the
    problem allows so v7x's second TensorCore gets work.
    """
    n = int(n_packed_rows)
    if n <= 8:
        return n                         # full-extent block (allowed)
    if n >= 512:
        return 256                       # 256 * 1664 * 4 B ~= 1.7 MiB
    half = (n // 2 // 8) * 8
    return max(8, half)


# ----------------------------------------------------------------------------
# Wrappers
# ----------------------------------------------------------------------------
@partial(jax.jit, static_argnames=("delta",), donate_argnums=(1,))
def generator_forward(linear_weight, x, delta=0.2):
    """Exact Pallas equivalent of Generator.forward (single instance).

    NOTE: x is donated and written in place; the caller's x buffer is
    invalidated after this call.

    Args:
      linear_weight: (1, 52) float32 parameter.
      x:             (2, 52) float32 input.
      delta:         static python float.
    Returns:
      (x_scaled (2, 52), weight_mapped (1, 52)).
    """
    rows, cols = x.shape
    wrows, wcols = linear_weight.shape
    assert wcols == cols and rows == 2 * wrows

    cost = pl.CostEstimate(
        flops=int(3 * rows * cols),
        transcendentals=int(wrows * wcols),
        bytes_accessed=int((2 * rows * cols + 2 * wrows * wcols) * 4),
    )

    return pl.pallas_call(
        _generator_kernel(float(delta)),
        out_shape=(
            jax.ShapeDtypeStruct((rows, cols), x.dtype),
            jax.ShapeDtypeStruct((wrows, wcols), linear_weight.dtype),
        ),
        in_specs=[
            pl.BlockSpec((wrows, wcols), lambda: (0, 0)),   # full-array blocks
            pl.BlockSpec((rows, cols), lambda: (0, 0)),
        ],
        out_specs=(
            pl.BlockSpec((rows, cols), lambda: (0, 0)),
            pl.BlockSpec((wrows, wcols), lambda: (0, 0)),
        ),
        # Scaled x written in place over the x input buffer (same shape/dtype).
        input_output_aliases={1: 0},
        cost_estimate=cost,
    )(linear_weight, x)


@partial(jax.jit, static_argnames=("delta",), donate_argnums=(1,))
def generator_forward_batched(linear_weight, xb, delta=0.2):
    """Apply Generator.forward to B independent (2, 52) inputs in ONE kernel.

    NOTE: xb is donated; the caller's xb buffer is invalidated after the call.

    Args:
      linear_weight: (1, 52) float32 parameter (shared across the batch).
      xb:            (B, 2, 52) float32 inputs.
      delta:         static python float.
    Returns:
      (xb_scaled (B, 2, 52), weight_mapped (1, 52)).
    """
    B, two, cols = xb.shape
    wrows, wcols = linear_weight.shape
    assert two == 2 and wcols == cols == _COLS and wrows == 1

    # weight_mapped computed ONCE (52 elems; the EUP tanh is hoisted out of the
    # grid loop), then lane-packed so every vreg lane is used (1664 = 13*128).
    wm = jnp.tanh(linear_weight) * float(delta) + 1.0       # (1, 52) f32
    wm_packed = jnp.tile(wm, (1, _LANE_PACK))               # (1, 1664)

    total_rows = 2 * B
    n_packed = pl.cdiv(total_rows, _LANE_PACK)              # packed rows needed
    tile = _pick_packed_tile(n_packed)
    n_packed_pad = pl.cdiv(n_packed, tile) * tile
    rows_pad = n_packed_pad * _LANE_PACK
    grid = n_packed_pad // tile

    # Row-stack the batch: (B, 2, 52) -> (2*B, 52). Contiguous, free reshape.
    x2d = xb.reshape(total_rows, cols)
    if rows_pad != total_rows:
        # TODO(synk): row padding defeats buffer donation (extra copy); choose B
        # with 2*B % 32 == 0 (and divisible tiles) to keep the in-place alias.
        x2d = jnp.pad(x2d, ((0, rows_pad - total_rows), (0, 0)))
    xp = x2d.reshape(n_packed_pad, _PACKED_COLS)            # lane-dense layout

    cost = pl.CostEstimate(
        flops=int(n_packed_pad * _PACKED_COLS),
        transcendentals=0,
        bytes_accessed=int((2 * n_packed_pad * _PACKED_COLS + _PACKED_COLS) * 4),
    )

    outp = pl.pallas_call(
        _scale_kernel,
        out_shape=jax.ShapeDtypeStruct((n_packed_pad, _PACKED_COLS), xb.dtype),
        grid=(grid,),
        in_specs=[
            pl.BlockSpec((1, _PACKED_COLS), lambda i: (0, 0)),     # shared wm
            pl.BlockSpec((tile, _PACKED_COLS), lambda i: (i, 0)),  # x row tile
        ],
        out_specs=pl.BlockSpec((tile, _PACKED_COLS), lambda i: (i, 0)),
        input_output_aliases={1: 0},            # scaled x written in place
        compiler_params=pltpu.CompilerParams(
            dimension_semantics=("parallel",),  # megacore sharding on v7x
        ),
        cost_estimate=cost,
    )(wm_packed, xp)

    out2d = outp.reshape(rows_pad, cols)[:total_rows]
    return out2d.reshape(B, 2, cols), wm


# ----------------------------------------------------------------------------
# Self-test
# ----------------------------------------------------------------------------
if __name__ == "__main__":
    key = jax.random.PRNGKey(0)
    k_w, k_x, k_b = jax.random.split(key, 3)

    delta = 0.2
    # Deterministic "parameter" init mirroring torch.rand(1, 52) (uniform [0,1)).
    linear_weight = jax.random.uniform(k_w, (1, 52), dtype=jnp.float32)
    # Single-instance input, consistent with kron(ones(2,1), (1,52)) * x.
    x = jax.random.normal(k_x, (2, 52), dtype=jnp.float32)
    # Batched demo: 64 independent (2, 52) problems sharing the same weight
    # (2*B = 128 rows -> packs exactly into lane-dense rows, no padding, so the
    # donation + in-place alias is honored).
    B = 64
    xb = jax.random.normal(k_b, (B, 2, 52), dtype=jnp.float32)

    # Plain-JAX references computed BEFORE the kernel calls: the kernels donate
    # and overwrite their x / xb input buffers.
    wm_ref = jnp.tanh(linear_weight) * delta + 1.0
    out_ref = jnp.tile(wm_ref, (2, 1)) * x
    outb_ref = xb * wm_ref[None]
    jax.block_until_ready((wm_ref, out_ref, outb_ref))

    # --- single-instance (exact module semantics, compat shim) ---
    out, wm = generator_forward(linear_weight, x, delta=delta)
    jax.block_until_ready((out, wm))
    assert jnp.allclose(wm, wm_ref, atol=1e-5, rtol=1e-5)
    assert jnp.allclose(out, out_ref, atol=1e-5, rtol=1e-5)

    # --- batched, lane-dense, overhead-amortised variant ---
    outb, wmb = generator_forward_batched(linear_weight, xb, delta=delta)
    jax.block_until_ready((outb, wmb))
    assert jnp.allclose(wmb, wm_ref, atol=1e-5, rtol=1e-5)
    assert jnp.allclose(outb, outb_ref, atol=1e-5, rtol=1e-5)

    print("KERNEL_OK")
</pallas_src>

<mosaic_0001>
module attributes {stable_mosaic.version = 11 : i64} {
  func.func @kernel(%arg0: memref<1x52xf32, #tpu.memory_space<vmem>>, %arg1: memref<2x52xf32, #tpu.memory_space<vmem>>, %arg2: memref<2x52xf32, #tpu.memory_space<vmem>>, %arg3: memref<1x52xf32, #tpu.memory_space<vmem>>) attributes {dimension_semantics = [], scalar_prefetch = 0 : i64, scratch_operands = 0 : i64, tpu.core_type = #tpu.core_type<tc>} {
    %c0 = arith.constant 0 : index
    %c0_0 = arith.constant 0 : index
    %0 = vector.load %arg0[%c0, %c0_0] : memref<1x52xf32, #tpu.memory_space<vmem>>, vector<1x52xf32>
    %1 = math.tanh %0 : vector<1x52xf32>
    %cst = arith.constant 2.000000e-01 : f32
    %2 = vector.broadcast %cst : f32 to vector<1x52xf32>
    %3 = arith.mulf %1, %2 : vector<1x52xf32>
    %cst_1 = arith.constant 1.000000e+00 : f32
    %4 = vector.broadcast %cst_1 : f32 to vector<1x52xf32>
    %5 = arith.addf %3, %4 : vector<1x52xf32>
    %c0_2 = arith.constant 0 : index
    %c0_3 = arith.constant 0 : index
    %6 = vector.load %arg3[%c0_2, %c0_3] : memref<1x52xf32, #tpu.memory_space<vmem>>, vector<1x52xf32>
    tpu.vector_store %arg3[%c0_2, %c0_3], %5 {strides = array<i32>} : memref<1x52xf32, #tpu.memory_space<vmem>>, vector<1x52xf32>,
    %c0_4 = arith.constant 0 : index
    %c0_5 = arith.constant 0 : index
    %7 = vector.load %arg1[%c0_4, %c0_5] : memref<2x52xf32, #tpu.memory_space<vmem>>, vector<2x52xf32>
    %8 = vector.broadcast %5 : vector<1x52xf32> to vector<2x52xf32>
    %9 = arith.mulf %7, %8 : vector<2x52xf32>
    %c0_6 = arith.constant 0 : index
    %c0_7 = arith.constant 0 : index
    %10 = vector.load %arg2[%c0_6, %c0_7] : memref<2x52xf32, #tpu.memory_space<vmem>>, vector<2x52xf32>
    tpu.vector_store %arg2[%c0_6, %c0_7], %9 {strides = array<i32>} : memref<2x52xf32, #tpu.memory_space<vmem>>, vector<2x52xf32>,
    return
  }
}

</mosaic_0001>

<bundles_post_ra>
// kernel: generator_forward.1
= control target key start
LH: loop header
LB: loop body
LE: loop exit
PB: predicated region body
PF: predicated region fallthrough
CT: control target
= control target key end

     0   :  { %9 = vsyncpa [#allocation3], 0  ;;  %s260_s0 = inlined_call_operand.hbm [shape: f32[1,52], index: 0, kind: input, shape index: {}]   ;;  %s261_s1 = inlined_call_operand.hbm [shape: f32[2,52], index: 1, kind: input, shape index: {}, may-alias: {1,2}]   ;;  %s262_s2 = inlined_call_operand.hbm [shape: f32[2,52], index: 2, kind: output, shape index: {0}, may-alias: {1,2}]   ;;  %s263_s3 = inlined_call_operand.hbm [shape: f32[1,52], index: 3, kind: output, shape index: {1}]  }
   0x1   :  { %10 = vsyncpa [#allocation6], 0 }
   0x2   :  { %11 = vsyncpa [#allocation4], 0 }
   0x3   :  { %12 = vsyncpa [#allocation9], 0  ;;  %s187_s12 = smov [#allocation2]   ;;  %s188_s14 = smov [#allocation5]  }
   0x4   :  { %s19_s13 = sshll.u32 %s187_s12, 4  ;;  %s29_s15 = sshll.u32 %s188_s14, 4  ;;  %s20_s13 = int_to_ptr.vmem [resolvable:$true] %s19_s13  ;;  %s30_s15 = int_to_ptr.vmem [resolvable:$true] %s29_s15 }
   0x5   :  { %s91_s18 = scalar_lea.hbm %s260_s0, 16 }
   0x6   :  { %p92_p0 = scmp.ne.s32.totalorder %s260_s0, %s91_s18  ;;  %p95_p1 = scmp.lt.u32.totalorder %s91_s18, %s260_s0 }
   0x8   :  { %p97_p2 = pnand %p95_p1, %p92_p0 }
   0xa   :  { %100 = shalt.err (!%p97_p2)
}
   0xb   :  { %s101_s23 = scalar_lea.vmem %s20_s13, 16  ;;  %s105_s24 = scalar_lea.vmem %s20_s13, 32 }
   0xc   :  { %p102_p3 = scmp.ne.s32.totalorder %s20_s13, %s101_s23  ;;  %p106_p4 = scmp.lt.s32.totalorder %s20_s13, %s20_s13 }
   0xd   :  { %p107_p5 = scmp.lt.s32.totalorder %s105_s24, %s101_s23 }
   0xf   :  { %p108_p6 = por %p107_p5, %p106_p4 }
  0x11   :  { %p109_p7 = pnand %p108_p6, %p102_p3 }
  0x13   :  { %112 = shalt.err (!%p109_p7)
}
  0x14   :  { %22 = dma.hbm_to_vmem [thread:$0]  %s260_s0, 16, %s20_s13, [#allocation3]  }
  0x15   :  { %s113_s29 = scalar_lea.hbm %s261_s1, 32 }
  0x16   :  { %p114_p8 = scmp.ne.s32.totalorder %s261_s1, %s113_s29  ;;  %p117_p9 = scmp.lt.u32.totalorder %s113_s29, %s261_s1 }
  0x18   :  { %p119_p10 = pnand %p117_p9, %p114_p8 }
  0x1a   :  { %122 = shalt.err (!%p119_p10)
}
  0x1b   :  { %s123_s7 = scalar_lea.vmem %s30_s15, 32  ;;  %p128_p12 = scmp.lt.s32.totalorder %s30_s15, %s30_s15 }
  0x1c   :  { %p124_p11 = scmp.ne.s32.totalorder %s30_s15, %s123_s7  ;;  %p129_p13 = scmp.lt.s32.totalorder %s123_s7, %s123_s7 }
  0x1e   :  { %p130_p0 = por %p129_p13, %p128_p12 }
  0x20   :  { %p131_p1 = pnand %p130_p0, %p124_p11 }
  0x22   :  { %134 = shalt.err (!%p131_p1)
}
  0x23   :  { %32 = dma.hbm_to_vmem [thread:$0]  %s261_s1, 32, %s30_s15, [#allocation6]  }
  0x24   :  { %179 = dma.done.wait [#allocation3], 16  }
  0x25   :  { %180 = vsyncadd [#allocation3], 4294967280 }
  0x26   :  { %181 = dma.done.wait [#allocation6], 32  }
  0x27   :  { %182 = vsyncadd [#allocation6], 4294967264  ;;  %v39_v0 = vld [vmem:[#allocation2] sm:$0x1]  ;;  %v47_v1 = vlaneseq  ;;  %s189_s9 = smov [#allocation8]   ;;  %vm43_vm0 = vcmask 417792  }
  0x28   :  { %89 = vtanh.f32 %v39_v0  ;;  %s71_s10 = sshll.u32 %s189_s9, 4  ;;  %v45_v7 = vld [vmem:[#allocation5] sm:$0x3]  ;;  %s190_s11 = smov [#allocation7]   ;;  %vm53_vm1 = vcmask 418816   ;;  %s72_s10 = int_to_ptr.vmem [resolvable:$true] %s71_s10 }
  0x29   :  { %v48_v2 = vshrl.u32 %v47_v1, 7  ;;  %s61_s12 = sshll.u32 %s190_s11, 4  ;;  %s135_s1 = scalar_lea.vmem %s72_s10, 16  ;;  %s62_s12 = int_to_ptr.vmem [resolvable:$true] %s61_s12 }
  0x2a   :  { %p136_p2 = scmp.ne.s32.totalorder %s72_s10, %s135_s1  ;;  %s139_s13 = scalar_lea.vmem %s72_s10, 32 }
  0x2b   :  { %v49_v5 = vsub.s32 0, %v48_v2  ;;  %p140_p3 = scmp.lt.s32.totalorder %s72_s10, %s72_s10  ;;  %p141_p4 = scmp.lt.s32.totalorder %s139_s13, %s135_s1 }
  0x2d   :  { %p142_p5 = por %p141_p4, %p140_p3 }
  0x2f   :  { %p143_p6 = pnand %p142_p5, %p136_p2 }
  0x32   :  { %v90_v3 = vpop.eup %89 }
  0x33   :  { %v41_v4 = vmul.f32 0.2, %v90_v3 }
  0x35   :  { %v42_v6 = vadd.f32 1.0, %v41_v4 }
  0x37   :  { %44 = vst.msk [vmem:[#allocation8] sm:$0x1] %vm43_vm0, %v42_v6  ;;  %v50_v8 = vrot.slane %v42_v6, %v49_v5 }
  0x38   :  { %146 = shalt.err (!%p143_p6)
}
  0x39   :  { %s147_s16 = scalar_lea.hbm %s263_s3, 16 }
  0x3a   :  { %p148_p7 = scmp.ne.s32.totalorder %s263_s3, %s147_s16  ;;  %p151_p8 = scmp.lt.u32.totalorder %s147_s16, %s263_s3 }
  0x3c   :  { %p153_p9 = pnand %p151_p8, %p148_p7 }
  0x3e   :  { %156 = shalt.err (!%p153_p9)
}
  0x3f   :  { %74 = dma.vmem_to_hbm [thread:$0]  %s72_s10, 16, %s263_s3, [#allocation9]   ;;  %v52_v9 = vmul.f32 %v50_v8, %v45_v7 }
  0x40   :  { %s157_s23 = scalar_lea.vmem %s62_s12, 32  ;;  %p162_p11 = scmp.lt.s32.totalorder %s62_s12, %s62_s12 }
  0x41   :  { %54 = vst.msk [vmem:[#allocation7] sm:$0x3] %vm53_vm1, %v52_v9  ;;  %p158_p10 = scmp.ne.s32.totalorder %s62_s12, %s157_s23  ;;  %p163_p12 = scmp.lt.s32.totalorder %s157_s23, %s157_s23 }
  0x43   :  { %p164_p13 = por %p163_p12, %p162_p11 }
  0x45   :  { %p165_p0 = pnand %p164_p13, %p158_p10 }
  0x47   :  { %168 = shalt.err (!%p165_p0)
}
  0x48   :  { %s169_s26 = scalar_lea.hbm %s262_s2, 32 }
  0x49   :  { %p170_p1 = scmp.ne.s32.totalorder %s262_s2, %s169_s26  ;;  %p173_p2 = scmp.lt.u32.totalorder %s169_s26, %s262_s2 }
  0x4b   :  { %p175_p3 = pnand %p173_p2, %p170_p1 }
  0x4d   :  { %178 = shalt.err (!%p175_p3)
}
  0x4e   :  { %64 = dma.vmem_to_hbm [thread:$0]  %s62_s12, 32, %s262_s2, [#allocation4]  }
  0x4f   :  { %183 = dma.done.wait [#allocation4], 32  }
  0x50   :  { %184 = vsyncadd [#allocation4], 4294967264 }
  0x51   :  { %185 = dma.done.wait [#allocation9], 16  }
  0x52   :  { %186 = vsyncadd [#allocation9], 4294967280 }
  0x53   :  { %81 = vsyncpa [#allocation3], 1 }
  0x54   :  { %82 = vsyncpa [#allocation6], 1 }
  0x55   :  { %83 = vsyncpa [#allocation4], 1 }
  0x56   :  { %84 = vsyncpa [#allocation9], 1 }

</bundles_post_ra>
